<compile_context>
chip_gen: v5e
topology: v5e:2x2
jax: 0.10.0
libtpu: 0.0.40
codegen_flags: <defaults>
</compile_context>

<pallas_src>
import functools
import math
from typing import NamedTuple

import jax
import jax.numpy as jnp
from jax.experimental import pallas as pl
from jax.experimental.pallas import tpu as pltpu


def _round_up(x, m):
    return ((x + m - 1) // m) * m


# ---------------------------------------------------------------------------
# Fused epilogue: exact (erf-based) GELU, built from ops that lower in Mosaic
# ---------------------------------------------------------------------------
_SQRT1_2 = 0.7071067811865476


def _erf(z):
    # Abramowitz & Stegun 7.1.26 rational approximation, |err| <= 1.5e-7.
    # Only mul/add/exp/where -> VPU + EUP; matches torch's exact-erf GELU to
    # well below the bf16-matmul noise floor.
    a1, a2, a3, a4, a5 = (0.254829592, -0.284496736, 1.421413741,
                          -1.453152027, 1.061405429)
    p = 0.3275911
    za = jnp.abs(z)
    t = 1.0 / (1.0 + p * za)
    poly = ((((a5 * t + a4) * t + a3) * t + a2) * t + a1) * t
    e = 1.0 - poly * jnp.exp(-za * za)
    return jnp.where(z < 0.0, -e, e)


def _gelu_exact(x):
    return 0.5 * x * (1.0 + _erf(x * _SQRT1_2))


# ---------------------------------------------------------------------------
# Pallas kernel: one MXU matmul per lane tile + fused bias/GELU epilogue
# ---------------------------------------------------------------------------
def _conv_mm_kernel(x_ref, w_ref, b_ref, o_ref, *, fuse_gelu):
    # x_ref: (Kc, T) bf16   w_ref: (Cout, Kc) bf16   b_ref: (Cout, 1) f32
    acc = jnp.dot(w_ref[...], x_ref[...],
                  preferred_element_type=jnp.float32)   # single MXU matmul
    acc = acc + b_ref[...]                              # fused bias (f32)
    if fuse_gelu:
        acc = _gelu_exact(acc)                          # fused GELU epilogue
    o_ref[...] = acc.astype(o_ref.dtype)


def _pick_lane_tile(total, kc_p, cout_p, in_bytes, out_bytes,
                    budget_bytes=8 << 20):
    # Double-buffered (input block + output block) footprint kept under
    # `budget_bytes` so tiles fit comfortably in v7x's 64 MiB VMEM as well as
    # v5e/v6e; tile is always a multiple of 128 lanes (unmasked stores).
    per_lane = 2 * (kc_p * in_bytes + cout_p * out_bytes)
    t = max(128, (budget_bytes // per_lane) // 128 * 128)
    return int(min(t, _round_up(total, 128)))


def conv2d_same(x, w, b=None, *, stride=1, fuse_gelu=False,
                mxu_dtype=jnp.bfloat16):
    """PyTorch-semantics Conv2d: NCHW x OIHW, padding=k//2, given stride."""
    n, cin, h, wd = x.shape
    cout, cin_w, kh, kw = w.shape
    assert cin_w == cin
    ph, pw = kh // 2, kw // 2
    ho = (h + 2 * ph - kh) // stride + 1
    wo = (wd + 2 * pw - kw) // stride + 1
    hw = ho * wo
    total = n * hw                      # batch folded into the lane axis
    kc = cin * kh * kw

    # --- im2col (wrapper side), laid out as (Cin*K*K, N*Ho*Wo) ----------------
    xb = x.astype(mxu_dtype)            # cast first: im2col copy is bf16, not f32
    if kh == 1 and kw == 1:
        xs = xb[:, :, ::stride, ::stride].transpose(1, 0, 2, 3).reshape(cin, total)
    else:
        # TODO(synk): K>1 still materializes the K*K im2col in HBM; a fully
        # in-kernel (manual-DMA) im2col would read the input only once.
        xpt = jnp.pad(xb, ((0, 0), (0, 0), (ph, ph), (pw, pw))
                      ).transpose(1, 0, 2, 3)          # (Cin, N, Hp, Wp)
        taps = []
        for i in range(kh):
            for j in range(kw):
                taps.append(xpt[:, :,
                                i:i + (ho - 1) * stride + 1:stride,
                                j:j + (wo - 1) * stride + 1:stride])
        xs = jnp.stack(taps, axis=1).reshape(kc, total)  # row = c*K*K + i*K + j
    wt = w.reshape(cout, kc)             # matches (c, i, j) flattening order

    # --- pad to TPU-friendly (sublane / lane) shapes ---------------------------
    in_bytes = jnp.dtype(mxu_dtype).itemsize
    kc_p = _round_up(kc, 16 if in_bytes == 2 else 8)   # packed contraction rows
    cout_p = _round_up(cout, 8)                        # f32 output sublanes
    tile = _pick_lane_tile(total, kc_p, cout_p, in_bytes, 4)
    total_p = _round_up(total, tile)

    xs = jnp.pad(xs, ((0, kc_p - kc), (0, total_p - total)))
    wt = jnp.pad(wt, ((0, cout_p - cout), (0, kc_p - kc))).astype(mxu_dtype)
    bt = jnp.zeros((cout,), jnp.float32) if b is None else b.astype(jnp.float32)
    bt = jnp.pad(bt, (0, cout_p - cout)).reshape(cout_p, 1)

    grid = (total_p // tile,)
    flops = 2 * cout * kc * total
    bytes_accessed = (kc_p * total_p * in_bytes + cout_p * kc_p * in_bytes
                      + cout_p * 4 + cout_p * total_p * 4)

    out = pl.pallas_call(
        functools.partial(_conv_mm_kernel, fuse_gelu=fuse_gelu),
        out_shape=jax.ShapeDtypeStruct((cout_p, total_p), jnp.float32),
        grid=grid,
        in_specs=[
            pl.BlockSpec((kc_p, tile), lambda t: (0, t)),
            pl.BlockSpec((cout_p, kc_p), lambda t: (0, 0)),   # weight resident
            pl.BlockSpec((cout_p, 1), lambda t: (0, 0)),      # bias resident
        ],
        out_specs=pl.BlockSpec((cout_p, tile), lambda t: (0, t)),
        compiler_params=pltpu.CompilerParams(
            dimension_semantics=("parallel",),
            vmem_limit_bytes=32 * 1024 * 1024),
        cost_estimate=pl.CostEstimate(
            flops=flops,
            transcendentals=(cout * total if fuse_gelu else 0),
            bytes_accessed=bytes_accessed),
    )(xs, wt, bt)

    return (out[:cout, :total]
            .reshape(cout, n, ho, wo)
            .transpose(1, 0, 2, 3))


# ---------------------------------------------------------------------------
# Glue (plain JAX)
# ---------------------------------------------------------------------------
def batchnorm2d_train(x, gamma, beta, eps=1e-5):
    # TODO(synk): train-mode batch statistics only (matches a freshly built
    # nn.BatchNorm2d); running-stats / eval mode are not modeled.
    m = jnp.mean(x, axis=(0, 2, 3), keepdims=True)
    v = jnp.mean((x - m) ** 2, axis=(0, 2, 3), keepdims=True)
    xn = (x - m) * jax.lax.rsqrt(v + eps)
    return xn * gamma.reshape(1, -1, 1, 1) + beta.reshape(1, -1, 1, 1)


# ---------------------------------------------------------------------------
# BasicConv module
# ---------------------------------------------------------------------------
class BasicConvCfg(NamedTuple):
    in_channel: int
    out_channel: int
    kernel_size: int
    stride: int
    bias: bool = True
    norm: bool = False
    relu: bool = True
    transpose: bool = False


def init_basic_conv(key, cfg: BasicConvCfg):
    # mirrors torch Conv2d default init: U(-1/sqrt(fan_in), 1/sqrt(fan_in))
    bias = cfg.bias and not cfg.norm        # `if bias and norm: bias = False`
    kw_, kb_ = jax.random.split(key)
    fan_in = cfg.in_channel * cfg.kernel_size * cfg.kernel_size
    bound = 1.0 / math.sqrt(fan_in)
    p = {"w": jax.random.uniform(
        kw_, (cfg.out_channel, cfg.in_channel, cfg.kernel_size, cfg.kernel_size),
        jnp.float32, -bound, bound)}
    p["b"] = (jax.random.uniform(kb_, (cfg.out_channel,), jnp.float32,
                                 -bound, bound) if bias else None)
    if cfg.norm:
        p["gamma"] = jnp.ones((cfg.out_channel,), jnp.float32)
        p["beta"] = jnp.zeros((cfg.out_channel,), jnp.float32)
    return p


def basic_conv_forward(params, x, cfg: BasicConvCfg):
    if cfg.transpose:
        # TODO(synk): ConvTranspose2d path of BasicConv is not implemented.
        raise NotImplementedError("transpose=True is not supported")
    y = conv2d_same(x, params["w"], params["b"], stride=cfg.stride,
                    fuse_gelu=(cfg.relu and not cfg.norm))
    if cfg.norm:
        y = batchnorm2d_train(y, params["gamma"], params["beta"])
        if cfg.relu:
            y = jax.nn.gelu(y, approximate=False)
    return y


def basic_conv_reference(params, x, cfg: BasicConvCfg):
    # plain-JAX reference for correctness checking
    p = cfg.kernel_size // 2
    y = jax.lax.conv_general_dilated(
        x, params["w"], (cfg.stride, cfg.stride), [(p, p), (p, p)],
        dimension_numbers=("NCHW", "OIHW", "NCHW"))
    if params["b"] is not None:
        y = y + params["b"].reshape(1, -1, 1, 1)
    if cfg.norm:
        y = batchnorm2d_train(y, params["gamma"], params["beta"])
    if cfg.relu:
        y = jax.nn.gelu(y, approximate=False)
    return y


# ---------------------------------------------------------------------------
if __name__ == "__main__":
    B, C, H, W = 2, 4, 16, 16
    key = jax.random.PRNGKey(0)
    kx, k1, k2, k3 = jax.random.split(key, 4)
    x = jax.random.normal(kx, (B, C, H, W), jnp.float32)

    configs = [
        BasicConvCfg(C, 8, 3, 1, bias=True, norm=False, relu=True),  # main path
        BasicConvCfg(C, 8, 1, 1, bias=True, norm=False, relu=True),  # 1x1 fast path
        BasicConvCfg(C, 8, 3, 2, bias=True, norm=True, relu=True),   # stride 2 + BN
    ]
    for cfg, k in zip(configs, (k1, k2, k3)):
        params = init_basic_conv(k, cfg)
        fwd = jax.jit(functools.partial(basic_conv_forward, cfg=cfg))
        out = fwd(params, x)
        jax.block_until_ready(out)

        p = cfg.kernel_size // 2
        ho = (H + 2 * p - cfg.kernel_size) // cfg.stride + 1
        wo = (W + 2 * p - cfg.kernel_size) // cfg.stride + 1
        assert out.shape == (B, cfg.out_channel, ho, wo), out.shape
        assert out.dtype == jnp.float32
        assert bool(jnp.all(jnp.isfinite(out)))

        ref = basic_conv_reference(params, x, cfg)
        err = float(jnp.max(jnp.abs(out - ref)))
        assert err < 5e-2, f"max |err| = {err} for cfg={cfg}"

    print("KERNEL_OK")
</pallas_src>

<mosaic_0001>
module attributes {stable_mosaic.version = 11 : i64} {
  func.func @_conv_mm_kernel(%arg0: i32, %arg1: memref<48x512xbf16, #tpu.memory_space<vmem>>, %arg2: memref<8x48xbf16, #tpu.memory_space<vmem>>, %arg3: memref<8x1xf32, #tpu.memory_space<vmem>>, %arg4: memref<8x512xf32, #tpu.memory_space<vmem>>) attributes {dimension_semantics = [#tpu.dimension_semantics<parallel>], iteration_bounds = array<i64: 1>, scalar_prefetch = 0 : i64, scratch_operands = 0 : i64, tpu.core_type = #tpu.core_type<tc>, window_params = [{transform_indices = @transform_0, window_bounds = array<i64: 48, 512>}, {pipeline_mode = #tpu.pipeline_mode<synchronous>, transform_indices = @transform_1, window_bounds = array<i64: 8, 48>}, {pipeline_mode = #tpu.pipeline_mode<synchronous>, transform_indices = @transform_2, window_bounds = array<i64: 8, 1>}, {transform_indices = @transform_3, window_bounds = array<i64: 8, 512>}]} {
    %c0 = arith.constant 0 : index
    %c0_0 = arith.constant 0 : index
    %0 = vector.load %arg2[%c0, %c0_0] : memref<8x48xbf16, #tpu.memory_space<vmem>>, vector<8x48xbf16>
    %c0_1 = arith.constant 0 : index
    %c0_2 = arith.constant 0 : index
    %1 = vector.load %arg1[%c0_1, %c0_2] : memref<48x512xbf16, #tpu.memory_space<vmem>>, vector<48x512xbf16>
    %cst = arith.constant dense<0.000000e+00> : vector<8x512xf32>
    %2 = tpu.matmul %0, %1, %cst {dimension_numbers = #tpu.dot_dimension_numbers<[1], [0], [0], [1], [0, 0, 1, 1], [], []>} : vector<8x48xbf16>, vector<48x512xbf16>, vector<8x512xf32> -> vector<8x512xf32>
    %c0_3 = arith.constant 0 : index
    %c0_4 = arith.constant 0 : index
    %3 = vector.load %arg3[%c0_3, %c0_4] : memref<8x1xf32, #tpu.memory_space<vmem>>, vector<8x1xf32>
    %4 = vector.broadcast %3 : vector<8x1xf32> to vector<8x512xf32>
    %5 = arith.addf %2, %4 : vector<8x512xf32>
    %cst_5 = arith.constant 5.000000e-01 : f32
    %6 = vector.broadcast %cst_5 : f32 to vector<8x512xf32>
    %7 = arith.mulf %6, %5 : vector<8x512xf32>
    %cst_6 = arith.constant 0.707106769 : f32
    %8 = vector.broadcast %cst_6 : f32 to vector<8x512xf32>
    %9 = arith.mulf %5, %8 : vector<8x512xf32>
    %10 = math.absf %9 : vector<8x512xf32>
    %cst_7 = arith.constant 0.327591091 : f32
    %11 = vector.broadcast %cst_7 : f32 to vector<8x512xf32>
    %12 = arith.mulf %11, %10 : vector<8x512xf32>
    %cst_8 = arith.constant 1.000000e+00 : f32
    %13 = vector.broadcast %cst_8 : f32 to vector<8x512xf32>
    %14 = arith.addf %13, %12 : vector<8x512xf32>
    %cst_9 = arith.constant 1.000000e+00 : f32
    %15 = vector.broadcast %cst_9 : f32 to vector<8x512xf32>
    %16 = arith.divf %15, %14 : vector<8x512xf32>
    %cst_10 = arith.constant 1.06140542 : f32
    %17 = vector.broadcast %cst_10 : f32 to vector<8x512xf32>
    %18 = arith.mulf %17, %16 : vector<8x512xf32>
    %cst_11 = arith.constant -1.45315206 : f32
    %19 = vector.broadcast %cst_11 : f32 to vector<8x512xf32>
    %20 = arith.addf %18, %19 : vector<8x512xf32>
    %21 = arith.mulf %20, %16 : vector<8x512xf32>
    %cst_12 = arith.constant 1.42141378 : f32
    %22 = vector.broadcast %cst_12 : f32 to vector<8x512xf32>
    %23 = arith.addf %21, %22 : vector<8x512xf32>
    %24 = arith.mulf %23, %16 : vector<8x512xf32>
    %cst_13 = arith.constant -0.284496725 : f32
    %25 = vector.broadcast %cst_13 : f32 to vector<8x512xf32>
    %26 = arith.addf %24, %25 : vector<8x512xf32>
    %27 = arith.mulf %26, %16 : vector<8x512xf32>
    %cst_14 = arith.constant 0.254829586 : f32
    %28 = vector.broadcast %cst_14 : f32 to vector<8x512xf32>
    %29 = arith.addf %27, %28 : vector<8x512xf32>
    %30 = arith.mulf %29, %16 : vector<8x512xf32>
    %cst_15 = arith.constant 0.000000e+00 : f32
    %31 = vector.broadcast %cst_15 : f32 to vector<8x512xf32>
    %32 = arith.subf %31, %10 : vector<8x512xf32>
    %33 = arith.mulf %32, %10 : vector<8x512xf32>
    %34 = math.exp %33 : vector<8x512xf32>
    %35 = arith.mulf %30, %34 : vector<8x512xf32>
    %cst_16 = arith.constant 1.000000e+00 : f32
    %36 = vector.broadcast %cst_16 : f32 to vector<8x512xf32>
    %37 = arith.subf %36, %35 : vector<8x512xf32>
    %cst_17 = arith.constant 0.000000e+00 : f32
    %38 = vector.broadcast %cst_17 : f32 to vector<8x512xf32>
    %39 = arith.cmpf olt, %9, %38 : vector<8x512xf32>
    %cst_18 = arith.constant 0.000000e+00 : f32
    %40 = vector.broadcast %cst_18 : f32 to vector<8x512xf32>
    %41 = arith.subf %40, %37 : vector<8x512xf32>
    %42 = arith.select %39, %41, %37 : vector<8x512xi1>, vector<8x512xf32>
    %cst_19 = arith.constant 1.000000e+00 : f32
    %43 = vector.broadcast %cst_19 : f32 to vector<8x512xf32>
    %44 = arith.addf %43, %42 : vector<8x512xf32>
    %45 = arith.mulf %7, %44 : vector<8x512xf32>
    %c0_20 = arith.constant 0 : index
    %c0_21 = arith.constant 0 : index
    %46 = vector.load %arg4[%c0_20, %c0_21] : memref<8x512xf32, #tpu.memory_space<vmem>>, vector<8x512xf32>
    tpu.vector_store %arg4[%c0_20, %c0_21], %45 {strides = array<i32>} : memref<8x512xf32, #tpu.memory_space<vmem>>, vector<8x512xf32>,
    return
  }
  func.func @transform_0(%arg0: i32) -> (i32, i32) {
    %c0_i32 = arith.constant 0 : i32
    %c0_i32_0 = arith.constant 0 : i32
    return %c0_i32, %arg0 : i32, i32
  }
  func.func @transform_1(%arg0: i32) -> (i32, i32) {
    %c0_i32 = arith.constant 0 : i32
    %c0_i32_0 = arith.constant 0 : i32
    %c0_i32_1 = arith.constant 0 : i32
    return %c0_i32, %c0_i32_0 : i32, i32
  }
  func.func @transform_2(%arg0: i32) -> (i32, i32) {
    %c0_i32 = arith.constant 0 : i32
    %c0_i32_0 = arith.constant 0 : i32
    %c0_i32_1 = arith.constant 0 : i32
    return %c0_i32, %c0_i32_0 : i32, i32
  }
  func.func @transform_3(%arg0: i32) -> (i32, i32) {
    %c0_i32 = arith.constant 0 : i32
    %c0_i32_0 = arith.constant 0 : i32
    return %c0_i32, %arg0 : i32, i32
  }
}

</mosaic_0001>

<bundles_post_ra>
// kernel: basic_conv_forward.1
= control target key start
LH: loop header
LB: loop body
LE: loop exit
PB: predicated region body
PF: predicated region fallthrough
CT: control target
= control target key end

     0   :  { %v400_v3 = vmov 0   ;;  %vm94_vm0 = vcmask 392192   ;;  %s568_s0 = inlined_call_operand.vmem [shape: bf16[48,512], index: 0, kind: input, shape index: {}]   ;;  %s569_s2 = inlined_call_operand.vmem [shape: f32[8,1], index: 2, kind: input, shape index: {}]   ;;  %s570_s1 = inlined_call_operand.vmem [shape: bf16[8,48], index: 1, kind: input, shape index: {}]   ;;  %s571_s3 = inlined_call_operand.vmem [shape: f32[8,512], index: 3, kind: output, shape index: {}]  }
   0x1   :  { %v352_v0 = vld [vmem:[%s568_s0 + $0x40] sm:$0xf]  ;;  %v380_v1 = vld [vmem:[%s568_s0 + $0x4c] sm:$0xf0]  ;;  %v378_v2 = vld [vmem:[%s568_s0 + $0x44] sm:$0xf]  ;;  %383 = vset.pattern.permute.xlu0 %v400_v3 }
   0x2   :  { %v353_v4 = vor.u32 %v380_v1, %v352_v0  ;;  %v354_v5 = vld [vmem:[%s568_s0 + $0x50] sm:$0xf0]  ;;  %v360_v6 = vld [vmem:[%s568_s0 + $0x48] sm:$0xf]  ;;  %v381_v7 = vld [vmem:[%s568_s0 + $0x54] sm:$0xf0] }
   0x3   :  { %v357_v8 = vor.u32 %v378_v2, %v354_v5  ;;  %v361_v9 = vor.u32 %v381_v7, %v360_v6  ;;  %v379_v10 = vld [vmem:[%s568_s0 + $0x4c] sm:$0xf]  ;;  %v362_v11 = vld [vmem:[%s568_s0 + $0x58] sm:$0xf0]  ;;  %v336_v12 = vld [vmem:[%s568_s0 + $0x20] sm:$0xf] }
   0x4   :  { %103 = vmatpush.bf16.msra.mxu0 %v353_v4  ;;  %v365_v13 = vor.u32 %v379_v10, %v362_v11  ;;  %v376_v14 = vld [vmem:[%s568_s0 + $0x2c] sm:$0xf0]  ;;  %v374_v15 = vld [vmem:[%s568_s0 + $0x24] sm:$0xf]  ;;  %v338_v16 = vld [vmem:[%s568_s0 + $0x30] sm:$0xf0] }
   0x5   :  { %116 = vmatpush.bf16.msra.mxu1 %v357_v8  ;;  %129 = vmatpush.bf16.msra.mxu2 %v361_v9  ;;  %v337_v17 = vor.u32 %v376_v14, %v336_v12  ;;  %v341_v18 = vor.u32 %v374_v15, %v338_v16  ;;  %v344_v19 = vld [vmem:[%s568_s0 + $0x28] sm:$0xf]  ;;  %v377_v20 = vld [vmem:[%s568_s0 + $0x34] sm:$0xf0]  ;;  %v375_v21 = vld [vmem:[%s568_s0 + $0x2c] sm:$0xf] }
   0x6   :  { %142 = vmatpush.bf16.msra.mxu3 %v365_v13  ;;  %v345_v22 = vor.u32 %v377_v20, %v344_v19  ;;  %v346_v23 = vld [vmem:[%s568_s0 + $0x38] sm:$0xf0]  ;;  %v320_v24 = vld [vmem:[%s568_s0] sm:$0xf]  ;;  %v372_v25 = vld [vmem:[%s568_s0 + $0xc] sm:$0xf0] }
   0x7   :  { %v349_v26 = vor.u32 %v375_v21, %v346_v23  ;;  %v370_v27 = vld [vmem:[%s568_s0 + $0x4] sm:$0xf]  ;;  %v322_v28 = vld [vmem:[%s568_s0 + $0x10] sm:$0xf0]  ;;  %v328_v29 = vld [vmem:[%s568_s0 + $0x8] sm:$0xf]  ;;  %v321_v30 = vor.u32 %v372_v25, %v320_v24 }
   0x8   :  { %104 = vmatpush.bf16.msra.mxu0 %v337_v17  ;;  %v373_v31 = vld [vmem:[%s568_s0 + $0x14] sm:$0xf0]  ;;  %v371_v32 = vld [vmem:[%s568_s0 + $0xc] sm:$0xf]  ;;  %v330_v33 = vld [vmem:[%s568_s0 + $0x18] sm:$0xf0]  ;;  %v325_v34 = vor.u32 %v370_v27, %v322_v28 }
   0x9   :  { %117 = vmatpush.bf16.msra.mxu1 %v341_v18  ;;  %130 = vmatpush.bf16.msra.mxu2 %v345_v22  ;;  %v329_v35 = vor.u32 %v373_v31, %v328_v29  ;;  %v28_v36 = vld [vmem:[%s569_s2] sm:$0xff]  ;;  %v333_v37 = vor.u32 %v371_v32, %v330_v33 }
   0xa   :  { %143 = vmatpush.bf16.msra.mxu3 %v349_v26  ;;  %31 = vperm.xlu0 %383, %v28_v36   ;;  %v15_v38 = vld [vmem:[%s570_s1] sm:$0xf] }
   0xc   :  { %105 = vmatpush.bf16.msra.mxu0 %v321_v30 }
   0xd   :  { %118 = vmatpush.bf16.msra.mxu1 %v325_v34  ;;  %131 = vmatpush.bf16.msra.mxu2 %v329_v35 }
   0xe   :  { %144 = vmatpush.bf16.msra.mxu3 %v333_v37 }
   0xf   :  { %366 = vmatmul.msk.bf16.vlgmr.msra.gmra.mxu0 %vm94_vm0, %v15_v38 }
  0x10   :  { %367 = vmatmul.msk.bf16.vlgmr.msra.gmra.mxu1 %vm94_vm0, %v15_v38  ;;  %368 = vmatmul.msk.bf16.vlgmr.msra.gmra.mxu2 %vm94_vm0, %v15_v38 }
  0x11   :  { %369 = vmatmul.msk.bf16.vlgmr.msra.gmra.mxu3 %vm94_vm0, %v15_v38 }
  0x7c   :  { %v32_v39 = vpop.permute.xlu0 %31 }
  0x8c   :  { %v107_v40 = vpop.f32.mrf.mxu0 }
  0x8d   :  { %v499_v41 = vadd.f32 %v107_v40, %v32_v39  ;;  %v120_v42 = vpop.f32.mrf.mxu1 }
  0x8e   :  { %v501_v43 = vadd.f32 %v120_v42, %v32_v39 }
  0x8f   :  { %v504_v44 = vmul.f32 0.70710677, %v499_v41 }
  0x90   :  { %v507_v45 = vmul.f32 0.70710677, %v501_v43 }
  0x91   :  { %v158_v46 = vand.u32 2147483647, %v504_v44 }
  0x92   :  { %v159_v47 = vand.u32 2147483647, %v507_v45 }
  0x93   :  { %v162_v48 = vmul.f32 0.3275911, %v158_v46  ;;  %v133_v49 = vpop.f32.mrf.mxu2  ;;  %v266_v17 = vsub.f32 0.0, %v158_v46 }
  0x94   :  { %v163_v50 = vmul.f32 0.3275911, %v159_v47  ;;  %v511_v51 = vadd.f32 %v133_v49, %v32_v39  ;;  %v146_v52 = vpop.f32.mrf.mxu3  ;;  %v109_v53 = vpop.f32.mrf.mxu0  ;;  %v267_v18 = vsub.f32 0.0, %v159_v47 }
  0x95   :  { %v166_v54 = vadd.f32 1.0, %v162_v48  ;;  %v122_v55 = vpop.f32.mrf.mxu1  ;;  %v516_v58 = vadd.f32 %v146_v52, %v32_v39  ;;  %v270_v28 = vmul.f32 %v266_v17, %v158_v46 }
  0x96   :  { %v167_v56 = vadd.f32 1.0, %v163_v50  ;;  %v514_v57 = vmul.f32 0.70710677, %v511_v51  ;;  %v271_v30 = vmul.f32 %v267_v18, %v159_v47 }
  0x97   :  { %384 = vrcp.f32 %v166_v54  ;;  %v522_v60 = vmul.f32 0.70710677, %v516_v58  ;;  %vm175_vm1 = vweird.f32 %v166_v54  ;;  %v181_v8 = vand.u32 2147483648, %v166_v54 }
  0x98   :  { %386 = vrcp.f32 %v167_v56  ;;  %v519_v59 = vand.u32 2147483647, %v514_v57  ;;  %v179_v12 = vand.u32 2147483647, %v166_v54  ;;  %v196_v13 = vand.u32 2147483648, %v167_v56 }
  0x99   :  { %v526_v1 = vand.u32 2147483647, %v522_v60  ;;  %vm190_vm3 = vweird.f32 %v167_v56  ;;  %v194_v15 = vand.u32 2147483647, %v167_v56  ;;  %v182_v19 = vor.u32 1.1754944e-38, %v181_v8 }
  0x9a   :  { %v164_v62 = vmul.f32 0.3275911, %v519_v59  ;;  %vm180_vm6 = vcmp.eq.f32.partialorder %v179_v12, 8.507059e+37  ;;  %v197_v23 = vor.u32 1.1754944e-38, %v196_v13  ;;  %v274_v42 = vmul.f32 1.442695, %v270_v28 }
  0x9b   :  { %v135_v61 = vpop.f32.mrf.mxu2  ;;  %v165_v6 = vmul.f32 0.3275911, %v526_v1  ;;  %vm195_vm8 = vcmp.eq.f32.partialorder %v194_v15, 8.507059e+37  ;;  %v276_v48 = vmul.f32 1.442695, %v271_v30 }
  0x9c   :  { %v148_v63 = vpop.f32.mrf.mxu3  ;;  %v168_v4 = vadd.f32 1.0, %v164_v62 }
  0x9d   :  { %v385_v0 = vpop.eup %384  ;;  %v529_v10 = vadd.f32 1.0, %v165_v6 }
  0x9e   :  { %v387_v2 = vpop.eup %386  ;;  %v171_v3 = vmul.f32 %v385_v0, %v166_v54  ;;  %388 = vrcp.f32 %v168_v4  ;;  %vm176_vm2 = vweird.f32 %v385_v0  ;;  %v209_v33 = vand.u32 2147483647, %v168_v4 }
  0x9f   :  { %v186_v5 = vmul.f32 %v387_v2, %v167_v56  ;;  %vm191_vm4 = vweird.f32 %v387_v2  ;;  %390 = vrcp.f32 %v529_v10  ;;  %vm177_vm5 = vmor %vm175_vm1, %vm176_vm2  ;;  %v211_v36 = vand.u32 2147483648, %v168_v4 }
  0xa0   :  { %v172_v7 = vsub.f32 1.0, %v171_v3  ;;  %vm192_vm7 = vmor %vm190_vm3, %vm191_vm4  ;;  %vm205_vm10 = vweird.f32 %v168_v4  ;;  %vm210_vm11 = vcmp.eq.f32.partialorder %v209_v33, 8.507059e+37  ;;  %v224_v53 = vand.u32 2147483647, %v529_v10 }
  0xa1   :  { %v187_v9 = vsub.f32 1.0, %v186_v5  ;;  %v212_v52 = vor.u32 1.1754944e-38, %v211_v36  ;;  %v226_v54 = vand.u32 2147483648, %v529_v10  ;;  %392 = vpow2.f32 %v274_v42 }
  0xa2   :  { %v173_v11 = vmul.f32 %v385_v0, %v172_v7  ;;  %vm220_vm14 = vweird.f32 %v529_v10  ;;  %394 = vpow2.f32 %v276_v48  ;;  %vm225_vm0 = vcmp.eq.f32.partialorder %v224_v53, 8.507059e+37 }
  0xa3   :  { %v188_v14 = vmul.f32 %v387_v2, %v187_v9  ;;  %v227_v6 = vor.u32 1.1754944e-38, %v226_v54  ;;  %vm290_vm1 = vcmp.lt.f32.partialorder %v504_v44, 0.0  ;;  %vm291_vm2 = vcmp.lt.f32.partialorder %v507_v45, 0.0 }
  0xa4   :  { %v174_v16 = vadd.f32 %v385_v0, %v173_v11  ;;  %v389_v21 = vpop.eup %388  ;;  %vm292_vm3 = vcmp.lt.f32.partialorder %v514_v57, 0.0  ;;  %vm293_vm4 = vcmp.lt.f32.partialorder %v522_v60, 0.0 }
  0xa5   :  { %v189_v20 = vadd.f32 %v387_v2, %v188_v14  ;;  %v201_v26 = vmul.f32 %v389_v21, %v168_v4  ;;  %v391_v34 = vpop.eup %390  ;;  %vm206_vm9 = vweird.f32 %v389_v21  ;;  %v269_v14 = vsub.f32 0.0, %v526_v1 }
  0xa6   :  { %v178_v22 = vsel %vm177_vm5, %v385_v0, %v174_v16  ;;  %v216_v39 = vmul.f32 %v391_v34, %v529_v10  ;;  %vm207_vm12 = vmor %vm205_vm10, %vm206_vm9  ;;  %vm221_vm13 = vweird.f32 %v391_v34  ;;  %v268_v0 = vsub.f32 0.0, %v519_v59 }
  0xa7   :  { %v533_v24 = vsel %vm180_vm6, %v182_v19, %v178_v22  ;;  %v193_v25 = vsel %vm192_vm7, %v387_v2, %v189_v20  ;;  %v202_v32 = vsub.f32 1.0, %v201_v26  ;;  %vm222_vm15 = vmor %vm220_vm14, %vm221_vm13  ;;  %v393_v18 = vpop.eup %392  ;;  %v273_v26 = vmul.f32 %v269_v14, %v526_v1 }
  0xa8   :  { %v230_v27 = vmul.f32 1.0614054, %v533_v24  ;;  %v198_v29 = vsel %vm195_vm8, %v197_v23, %v193_v25  ;;  %v217_v47 = vsub.f32 1.0, %v216_v39  ;;  %v272_v12 = vmul.f32 %v268_v0, %v519_v59  ;;  %v395_v22 = vpop.eup %394 }
  0xa9   :  { %v231_v31 = vmul.f32 1.0614054, %v198_v29  ;;  %v203_v38 = vmul.f32 %v389_v21, %v202_v32  ;;  %v150_v1 = vmul.f32 0.5, %v499_v41 }
  0xaa   :  { %v234_v35 = vadd.f32 -1.4531521, %v230_v27  ;;  %v218_v61 = vmul.f32 %v391_v34, %v217_v47  ;;  %v278_v25 = vmul.f32 1.442695, %v272_v12 }
  0xab   :  { %v235_v37 = vadd.f32 -1.4531521, %v231_v31  ;;  %v204_v46 = vadd.f32 %v389_v21, %v203_v38 }
  0xac   :  { %v238_v40 = vmul.f32 %v234_v35, %v533_v24  ;;  %v219_v4 = vadd.f32 %v391_v34, %v218_v61  ;;  %396 = vpow2.f32 %v278_v25  ;;  %v280_v35 = vmul.f32 1.442695, %v273_v26 }
  0xad   :  { %v239_v49 = vmul.f32 %v235_v37, %v198_v29  ;;  %v208_v56 = vsel %vm207_vm12, %v389_v21, %v204_v46 }
  0xae   :  { %v242_v50 = vadd.f32 1.4214138, %v238_v40  ;;  %v213_v63 = vsel %vm210_vm11, %v212_v52, %v208_v56  ;;  %v223_v9 = vsel %vm222_vm15, %v391_v34, %v219_v4  ;;  %398 = vpow2.f32 %v280_v35 }
  0xaf   :  { %v243_v55 = vadd.f32 1.4214138, %v239_v49  ;;  %v232_v3 = vmul.f32 1.0614054, %v213_v63  ;;  %v228_v13 = vsel %vm225_vm0, %v227_v6, %v223_v9  ;;  %v151_v52 = vmul.f32 0.5, %v501_v43 }
  0xb0   :  { %v246_v62 = vmul.f32 %v242_v50, %v533_v24  ;;  %v233_v17 = vmul.f32 1.0614054, %v228_v13 }
  0xb1   :  { %v247_v2 = vmul.f32 %v243_v55, %v198_v29  ;;  %v236_v8 = vadd.f32 -1.4531521, %v232_v3 }
  0xb2   :  { %v250_v5 = vadd.f32 -0.28449672, %v246_v62  ;;  %v237_v21 = vadd.f32 -1.4531521, %v233_v17  ;;  %v397_v50 = vpop.eup %396 }
  0xb3   :  { %v251_v7 = vadd.f32 -0.28449672, %v247_v2  ;;  %v240_v16 = vmul.f32 %v236_v8, %v213_v63  ;;  %v152_v2 = vmul.f32 0.5, %v511_v51 }
  0xb4   :  { %v254_v11 = vmul.f32 %v250_v5, %v533_v24  ;;  %v241_v59 = vmul.f32 %v237_v21, %v228_v13  ;;  %v399_v45 = vpop.eup %398 }
  0xb5   :  { %v255_v15 = vmul.f32 %v251_v7, %v198_v29  ;;  %v244_v20 = vadd.f32 1.4214138, %v240_v16  ;;  %v153_v7 = vmul.f32 0.5, %v516_v58 }
  0xb6   :  { %v258_v10 = vadd.f32 0.2548296, %v254_v11  ;;  %v245_v33 = vadd.f32 1.4214138, %v241_v59 }
  0xb7   :  { %v259_v19 = vadd.f32 0.2548296, %v255_v15  ;;  %v248_v28 = vmul.f32 %v244_v20, %v213_v63 }
  0xb8   :  { %v262_v23 = vmul.f32 %v258_v10, %v533_v24  ;;  %v249_v38 = vmul.f32 %v245_v33, %v228_v13 }
  0xb9   :  { %v263_v27 = vmul.f32 %v259_v19, %v198_v29  ;;  %v252_v32 = vadd.f32 -0.28449672, %v248_v28 }
  0xba   :  { %v282_v30 = vmul.f32 %v393_v18, %v262_v23  ;;  %v253_v42 = vadd.f32 -0.28449672, %v249_v38 }
  0xbb   :  { %v283_v31 = vmul.f32 %v395_v22, %v263_v27  ;;  %v256_v37 = vmul.f32 %v252_v32, %v213_v63 }
  0xbc   :  { %v286_v34 = vsub.f32 1.0, %v282_v30  ;;  %v257_v47 = vmul.f32 %v253_v42, %v228_v13 }
  0xbd   :  { %v287_v36 = vsub.f32 1.0, %v283_v31  ;;  %v260_v40 = vadd.f32 0.2548296, %v256_v37 }
  0xbe   :  { %v294_v39 = vsub.f32 0.0, %v286_v34  ;;  %v261_v44 = vadd.f32 0.2548296, %v257_v47 }
  0xbf   :  { %v295_v24 = vsub.f32 0.0, %v287_v36  ;;  %v264_v46 = vmul.f32 %v260_v40, %v213_v63 }
  0xc0   :  { %v298_v29 = vsel %vm290_vm1, %v294_v39, %v286_v34  ;;  %v265_v61 = vmul.f32 %v261_v44, %v228_v13 }
  0xc1   :  { %v302_v48 = vadd.f32 1.0, %v298_v29  ;;  %v299_v49 = vsel %vm291_vm2, %v295_v24, %v287_v36  ;;  %v284_v55 = vmul.f32 %v397_v50, %v264_v46 }
  0xc2   :  { %v303_v53 = vadd.f32 1.0, %v299_v49  ;;  %v285_v63 = vmul.f32 %v399_v45, %v265_v61 }
  0xc3   :  { %v306_v54 = vmul.f32 %v302_v48, %v150_v1  ;;  %v288_v41 = vsub.f32 1.0, %v284_v55 }
  0xc4   :  { %v307_v56 = vmul.f32 %v303_v53, %v151_v52  ;;  %v289_v0 = vsub.f32 1.0, %v285_v63 }
  0xc5   :  { %310 = vst [vmem:[%s571_s3] sm:$0xff] %v306_v54  ;;  %v296_v62 = vsub.f32 0.0, %v288_v41 }
  0xc6   :  { %311 = vst [vmem:[%s571_s3 + $0x8] sm:$0xff] %v307_v56  ;;  %v297_v4 = vsub.f32 0.0, %v289_v0 }
  0xc7   :  { %v300_v43 = vsel %vm292_vm3, %v296_v62, %v288_v41 }
  0xc8   :  { %v304_v3 = vadd.f32 1.0, %v300_v43  ;;  %v301_v6 = vsel %vm293_vm4, %v297_v4, %v289_v0 }
  0xc9   :  { %v305_v8 = vadd.f32 1.0, %v301_v6 }
  0xca   :  { %v308_v5 = vmul.f32 %v304_v3, %v152_v2 }
  0xcb   :  { %v309_v9 = vmul.f32 %v305_v8, %v153_v7 }
  0xcc   :  { %312 = vst [vmem:[%s571_s3 + $0x10] sm:$0xff] %v308_v5 }
  0xcd   :  { %313 = vst [vmem:[%s571_s3 + $0x18] sm:$0xff] %v309_v9 }

</bundles_post_ra>
